<compile_context>
chip_gen: v7x
topology: tpu7x:2x2x1
jax: 0.10.0
libtpu: 0.0.40
codegen_flags: <defaults>
</compile_context>

<pallas_src>
import jax
import jax.numpy as jnp
from jax.experimental import pallas as pl
from jax.experimental.pallas import tpu as pltpu

EPS = 1e-5
INV_SQRT2 = 0.7071067811865476
LANES = 128  # accumulator lane width (one vreg lane row)


def _erf(x):
    """erf via Abramowitz & Stegun 7.1.26 (|abs err| < 1.5e-7).

    Built from exp / mul / add / where only, so it lowers on every TPU
    generation. Accuracy is far below the bf16 matmul noise floor.
    # TODO(synk): switch to jax.lax.erf once its Mosaic lowering is guaranteed.
    """
    a1, a2, a3, a4, a5 = (0.254829592, -0.284496736, 1.421413741,
                          -1.453152027, 1.061405429)
    p = 0.3275911
    ax = jnp.abs(x)
    t = 1.0 / (1.0 + p * ax)
    poly = ((((a5 * t + a4) * t + a3) * t + a2) * t + a1) * t
    y = 1.0 - poly * jnp.exp(-ax * ax)
    return jnp.where(x >= 0.0, y, -y)


def _discriminator_kernel(x_ref, w1_ref, b1_ref, gamma_ref, beta_ref, w2_ref, o_ref):
    """One (core_shard, hidden_tile) grid step.

    o_ref is the shard's resident (B, LANES) f32 accumulator of per-lane
    partial sums; the single cross-lane reduce + b2 add happens in the wrapper.
    """
    j = pl.program_id(1)  # hidden-tile index within this shard (reduction axis)

    @pl.when(j == 0)
    def _():
        o_ref[...] = jnp.zeros_like(o_ref)

    # --- Linear 1 (MXU): bf16 x bf16 -> f32 accumulation ---
    h = jnp.dot(x_ref[...], w1_ref[...], preferred_element_type=jnp.float32)
    h = h + b1_ref[...]

    # --- BatchNorm1d (training mode: biased batch stats, per hidden column).
    #     Requires the FULL batch in this x block (do not tile B).
    mean = jnp.mean(h, axis=0, keepdims=True)
    centered = h - mean
    var = jnp.mean(centered * centered, axis=0, keepdims=True)
    hn = centered * jax.lax.rsqrt(var + EPS)
    hn = hn * gamma_ref[...] + beta_ref[...]

    # --- GELU (exact erf form). The 0.5 factor is folded into w2 by the wrapper.
    g = hn * (1.0 + _erf(hn * INV_SQRT2))

    # --- Linear 2 partial: per-lane accumulation (pure VALU, no XLU reduce,
    #     no lane broadcast). Fold tile_h columns into 128 accumulator lanes
    #     with static 128-wide slices (unrolled at trace time).
    gw = g * w2_ref[...]                       # (B, tile_h); w2 carries the 0.5
    tile_h = gw.shape[1]
    acc = gw[:, 0:LANES]
    for k in range(1, tile_h // LANES):
        acc = acc + gw[:, k * LANES:(k + 1) * LANES]
    o_ref[...] += acc


def _num_tensorcores():
    """v7x exposes two TensorCores per chip; v5e/v6e have one."""
    try:
        kind = jax.devices()[0].device_kind.lower()
        if "v7" in kind or "7x" in kind:
            return 2
    except Exception:
        pass
    return 1


def _lane_step():
    """Preferred tile granularity: 256 for the 2x256x256 MXUs (v6e/v7x), 128 on v5e."""
    try:
        kind = jax.devices()[0].device_kind.lower()
        if "v5 lite" in kind or "v5lite" in kind or "v5e" in kind:
            return 128
    except Exception:
        pass
    return 256


def _vmem_limit_bytes():
    """Generation-aware VMEM cap: physical capacity minus ~25% headroom."""
    try:
        cap = int(pltpu.get_tpu_info().vmem_capacity_bytes)
    except Exception:
        cap = 64 << 20  # conservative fallback (v7x physical size)
    return (cap * 3) // 4


def _pick_tile_h(b, d, h_pad, budget, mm_bytes, pref_step):
    """Largest hidden tile (multiple of 128 dividing h_pad) whose working set fits.

    Working-set model: double-buffered w1 tile + per-hidden vectors, a possibly
    double-buffered resident x block, the resident output accumulator, ~3 live
    (B, tile_h) f32 activation slabs, plus compiler-internal scratch.
    """
    def fits(t):
        resident = 2 * b * d * mm_bytes          # resident x (assume 2 buffers)
        resident += b * LANES * 4                # output accumulator
        per_step = d * t * mm_bytes + 4 * t * 4  # w1 tile + b1/gamma/beta/w2 tiles
        acts = 3 * b * t * 4                     # h / hn / g f32 temporaries
        scratch = 2 << 20                        # compiler-internal scratch
        return resident + 2 * per_step + acts + scratch <= budget

    if fits(h_pad):
        return h_pad                             # single grid step when it all fits
    for step in (pref_step, LANES):
        t = (h_pad // step) * step
        while t >= step:
            if h_pad % t == 0 and fits(t):
                return t
            t -= step
    # TODO(synk): if even a 128-wide tile does not fit (large B*D on v7x's
    # 64 MiB VMEM), stream x in D-chunks from pl.ANY or use two-pass BN stats.
    return LANES


def discriminator_forward(x_nchw, params, *, tile_h=None, use_bf16_matmul=True):
    """x_nchw: (B, C, H, W) float32.  Returns (B, 1) float32 logits."""
    w1, b1, gamma, beta, w2_row, b2 = params
    b = x_nchw.shape[0]
    x_flat = x_nchw.reshape(b, -1)  # row-major flatten, same as torch .reshape(b, -1)
    d = x_flat.shape[1]
    hidden = w1.shape[1]

    # Pad hidden to a lane multiple so every tile is 128-aligned. Padded
    # columns (w1=b1=beta=w2=0) contribute exactly zero to the logits.
    h_pad = -(-hidden // LANES) * LANES
    pad = h_pad - hidden
    w2_half = 0.5 * w2_row  # fold GELU's 0.5 into the final weights
    if pad:
        w1 = jnp.pad(w1, ((0, 0), (0, pad)))
        b1 = jnp.pad(b1, ((0, 0), (0, pad)))
        gamma = jnp.pad(gamma, ((0, 0), (0, pad)), constant_values=1.0)
        beta = jnp.pad(beta, ((0, 0), (0, pad)))
        w2_half = jnp.pad(w2_half, ((0, 0), (0, pad)))

    mm_dtype = jnp.bfloat16 if use_bf16_matmul else jnp.float32
    x_mm = x_flat.astype(mm_dtype)
    w1_mm = w1.astype(mm_dtype)
    # TODO(synk): optionally store w1 as int8 (v6e MXU) / fp8 (v7x) with a
    # per-column scale folded into gamma to halve weight-streaming HBM bytes.

    vmem_limit = _vmem_limit_bytes()
    if tile_h is None:
        tile_h = _pick_tile_h(b, d, h_pad, int(vmem_limit * 0.9),
                              jnp.dtype(mm_dtype).itemsize, _lane_step())
    assert h_pad % tile_h == 0 and tile_h % LANES == 0, \
        "tile_h must divide the 128-padded hidden dim and be a multiple of 128"

    n_tiles = h_pad // tile_h
    # Shard hidden tiles across TensorCores (v7x) via a leading parallel axis;
    # each core accumulates into its own 128-lane output slab.
    num_shards = _num_tensorcores()
    if n_tiles % num_shards != 0:
        num_shards = 1
    tiles_per_shard = n_tiles // num_shards

    def hidden_map(c, j):
        return (0, c * tiles_per_shard + j)

    grid_spec = pltpu.PrefetchScalarGridSpec(
        num_scalar_prefetch=0,
        grid=(num_shards, tiles_per_shard),
        in_specs=[
            # NOTE: BN batch stats need the FULL batch in one block; never tile B.
            pl.BlockSpec((b, d), lambda c, j: (0, 0)),       # x: resident
            pl.BlockSpec((d, tile_h), hidden_map),           # w1 tile (streamed)
            pl.BlockSpec((1, tile_h), hidden_map),           # b1
            pl.BlockSpec((1, tile_h), hidden_map),           # gamma
            pl.BlockSpec((1, tile_h), hidden_map),           # beta
            pl.BlockSpec((1, tile_h), hidden_map),           # 0.5 * w2 (as a row)
        ],
        out_specs=pl.BlockSpec((b, LANES), lambda c, j: (0, c)),  # per-shard slab
    )

    out_padded = pl.pallas_call(
        _discriminator_kernel,
        out_shape=jax.ShapeDtypeStruct((b, num_shards * LANES), jnp.float32),
        grid_spec=grid_spec,
        compiler_params=pltpu.CompilerParams(
            dimension_semantics=("parallel", "arbitrary"),
            vmem_limit_bytes=vmem_limit,
        ),
    )(x_mm, w1_mm, b1, gamma, beta, w2_half)

    # ONE cross-lane (and cross-shard) reduction + final bias, outside the kernel.
    return jnp.sum(out_padded, axis=1, keepdims=True) + b2


def init_params(key, input_dim, hidden_dim):
    """Deterministic init mimicking PyTorch defaults (uniform +/- 1/sqrt(fan_in))."""
    k1, k2, k3, k4 = jax.random.split(key, 4)
    lim1 = 1.0 / jnp.sqrt(input_dim)
    lim2 = 1.0 / jnp.sqrt(hidden_dim)
    # w1 stored pre-transposed (in, out) so the kernel does x @ W directly;
    # w2 stored as a (1, hidden) row for the per-lane accumulate.
    w1 = jax.random.uniform(k1, (input_dim, hidden_dim), jnp.float32, -lim1, lim1)
    b1 = jax.random.uniform(k2, (1, hidden_dim), jnp.float32, -lim1, lim1)
    gamma = jnp.ones((1, hidden_dim), jnp.float32)
    beta = jnp.zeros((1, hidden_dim), jnp.float32)
    w2_row = jax.random.uniform(k3, (1, hidden_dim), jnp.float32, -lim2, lim2)
    b2 = jax.random.uniform(k4, (1, 1), jnp.float32, -lim2, lim2)
    return (w1, b1, gamma, beta, w2_row, b2)


def _reference(x_nchw, params, *, use_bf16_matmul=True):
    """Pure-JAX reference (optionally matching the kernel's bf16 first matmul)."""
    w1, b1, gamma, beta, w2_row, b2 = params
    b = x_nchw.shape[0]
    x = x_nchw.reshape(b, -1)
    mm_dtype = jnp.bfloat16 if use_bf16_matmul else jnp.float32
    h = jnp.dot(x.astype(mm_dtype), w1.astype(mm_dtype),
                preferred_element_type=jnp.float32) + b1
    mean = jnp.mean(h, axis=0, keepdims=True)
    var = jnp.mean((h - mean) ** 2, axis=0, keepdims=True)
    hn = (h - mean) * jax.lax.rsqrt(var + EPS) * gamma + beta
    g = 0.5 * hn * (1.0 + jax.lax.erf(hn * INV_SQRT2))
    return g @ w2_row.T + b2


if __name__ == "__main__":
    # Small shapes consistent with the module: out_ch=1, out_h=8, out_w=8, mult=4
    B, C, Himg, Wimg = 4, 1, 8, 8
    mult = 4
    input_dim = C * Himg * Wimg          # 64
    hidden_dim = int(input_dim * mult)   # 256

    key = jax.random.PRNGKey(0)
    kx, kp = jax.random.split(key)
    x = jax.random.normal(kx, (B, C, Himg, Wimg), jnp.float32)
    params = init_params(kp, input_dim, hidden_dim)

    ref_matched = _reference(x, params, use_bf16_matmul=True)   # same bf16 matmul path
    ref_f32 = _reference(x, params, use_bf16_matmul=False)      # full-f32 sanity check

    # Default path: auto tile -> single grid step at these toy sizes.
    out = jax.block_until_ready(discriminator_forward(x, params))
    assert out.shape == (B, 1)
    assert jnp.allclose(out, ref_matched, atol=5e-4, rtol=5e-4), (out, ref_matched)
    assert jnp.allclose(out, ref_f32, atol=5e-2, rtol=5e-2), (out, ref_f32)

    # Tiled path: tile_h=128 exercises the resident-accumulator reduction axis.
    out_tiled = jax.block_until_ready(discriminator_forward(x, params, tile_h=128))
    assert out_tiled.shape == (B, 1)
    assert jnp.allclose(out_tiled, ref_matched, atol=5e-4, rtol=5e-4), (out_tiled, ref_matched)

    print("KERNEL_OK")
</pallas_src>

<mosaic_0001>
module attributes {stable_mosaic.version = 11 : i64} {
  func.func @_discriminator_kernel(%arg0: i32, %arg1: i32, %arg2: memref<4x64xbf16, #tpu.memory_space<vmem>>, %arg3: memref<64x256xbf16, #tpu.memory_space<vmem>>, %arg4: memref<1x256xf32, #tpu.memory_space<vmem>>, %arg5: memref<1x256xf32, #tpu.memory_space<vmem>>, %arg6: memref<1x256xf32, #tpu.memory_space<vmem>>, %arg7: memref<1x256xf32, #tpu.memory_space<vmem>>, %arg8: memref<4x128xf32, #tpu.memory_space<vmem>>) attributes {dimension_semantics = [#tpu.dimension_semantics<parallel>, #tpu.dimension_semantics<arbitrary>], iteration_bounds = array<i64: 1, 1>, scalar_prefetch = 0 : i64, scratch_operands = 0 : i64, tpu.core_type = #tpu.core_type<tc>, window_params = [{pipeline_mode = #tpu.pipeline_mode<synchronous>, transform_indices = @transform_0, window_bounds = array<i64: 4, 64>}, {transform_indices = @transform_1, window_bounds = array<i64: 64, 256>}, {transform_indices = @transform_2, window_bounds = array<i64: 1, 256>}, {transform_indices = @transform_3, window_bounds = array<i64: 1, 256>}, {transform_indices = @transform_4, window_bounds = array<i64: 1, 256>}, {transform_indices = @transform_5, window_bounds = array<i64: 1, 256>}, {transform_indices = @transform_6, window_bounds = array<i64: 4, 128>}]} {
    %c0_i32 = arith.constant 0 : i32
    %0 = arith.cmpi eq, %arg1, %c0_i32 : i32
    %1 = arith.extui %0 : i1 to i32
    %c0_i32_0 = arith.constant 0 : i32
    %2 = arith.cmpi ne, %1, %c0_i32_0 : i32
    scf.if %2 {
      %cst_35 = arith.constant 0.000000e+00 : f32
      %78 = vector.broadcast %cst_35 : f32 to vector<4x128xf32>
      %c0_36 = arith.constant 0 : index
      %c0_37 = arith.constant 0 : index
      %79 = vector.load %arg8[%c0_36, %c0_37] : memref<4x128xf32, #tpu.memory_space<vmem>>, vector<4x128xf32>
      tpu.vector_store %arg8[%c0_36, %c0_37], %78 {strides = array<i32>} : memref<4x128xf32, #tpu.memory_space<vmem>>, vector<4x128xf32>,
    } else {
    }
    %c0 = arith.constant 0 : index
    %c0_1 = arith.constant 0 : index
    %3 = vector.load %arg2[%c0, %c0_1] : memref<4x64xbf16, #tpu.memory_space<vmem>>, vector<4x64xbf16>
    %c0_2 = arith.constant 0 : index
    %c0_3 = arith.constant 0 : index
    %4 = vector.load %arg3[%c0_2, %c0_3] : memref<64x256xbf16, #tpu.memory_space<vmem>>, vector<64x256xbf16>
    %cst = arith.constant dense<0.000000e+00> : vector<4x256xf32>
    %5 = tpu.matmul %3, %4, %cst {dimension_numbers = #tpu.dot_dimension_numbers<[1], [0], [0], [1], [0, 0, 1, 1], [], []>} : vector<4x64xbf16>, vector<64x256xbf16>, vector<4x256xf32> -> vector<4x256xf32>
    %c0_4 = arith.constant 0 : index
    %c0_5 = arith.constant 0 : index
    %6 = vector.load %arg4[%c0_4, %c0_5] : memref<1x256xf32, #tpu.memory_space<vmem>>, vector<1x256xf32>
    %7 = vector.broadcast %6 : vector<1x256xf32> to vector<4x256xf32>
    %8 = arith.addf %5, %7 : vector<4x256xf32>
    %cst_6 = arith.constant dense<0.000000e+00> : vector<256xf32>
    %9 = vector.multi_reduction <add>, %8, %cst_6 [0] : vector<4x256xf32> to vector<256xf32>
    %10 = vector.shape_cast %9 : vector<256xf32> to vector<1x256xf32>
    %cst_7 = arith.constant 4.000000e+00 : f32
    %11 = vector.broadcast %cst_7 : f32 to vector<1x256xf32>
    %12 = arith.divf %10, %11 : vector<1x256xf32>
    %13 = vector.broadcast %12 : vector<1x256xf32> to vector<4x256xf32>
    %14 = arith.subf %8, %13 : vector<4x256xf32>
    %15 = arith.mulf %14, %14 : vector<4x256xf32>
    %cst_8 = arith.constant dense<0.000000e+00> : vector<256xf32>
    %16 = vector.multi_reduction <add>, %15, %cst_8 [0] : vector<4x256xf32> to vector<256xf32>
    %17 = vector.shape_cast %16 : vector<256xf32> to vector<1x256xf32>
    %cst_9 = arith.constant 4.000000e+00 : f32
    %18 = vector.broadcast %cst_9 : f32 to vector<1x256xf32>
    %19 = arith.divf %17, %18 : vector<1x256xf32>
    %cst_10 = arith.constant 9.99999974E-6 : f32
    %20 = vector.broadcast %cst_10 : f32 to vector<1x256xf32>
    %21 = arith.addf %19, %20 : vector<1x256xf32>
    %22 = math.rsqrt %21 : vector<1x256xf32>
    %23 = vector.broadcast %22 : vector<1x256xf32> to vector<4x256xf32>
    %24 = arith.mulf %14, %23 : vector<4x256xf32>
    %c0_11 = arith.constant 0 : index
    %c0_12 = arith.constant 0 : index
    %25 = vector.load %arg5[%c0_11, %c0_12] : memref<1x256xf32, #tpu.memory_space<vmem>>, vector<1x256xf32>
    %26 = vector.broadcast %25 : vector<1x256xf32> to vector<4x256xf32>
    %27 = arith.mulf %24, %26 : vector<4x256xf32>
    %c0_13 = arith.constant 0 : index
    %c0_14 = arith.constant 0 : index
    %28 = vector.load %arg6[%c0_13, %c0_14] : memref<1x256xf32, #tpu.memory_space<vmem>>, vector<1x256xf32>
    %29 = vector.broadcast %28 : vector<1x256xf32> to vector<4x256xf32>
    %30 = arith.addf %27, %29 : vector<4x256xf32>
    %cst_15 = arith.constant 0.707106769 : f32
    %31 = vector.broadcast %cst_15 : f32 to vector<4x256xf32>
    %32 = arith.mulf %30, %31 : vector<4x256xf32>
    %33 = math.absf %32 : vector<4x256xf32>
    %cst_16 = arith.constant 0.327591091 : f32
    %34 = vector.broadcast %cst_16 : f32 to vector<4x256xf32>
    %35 = arith.mulf %34, %33 : vector<4x256xf32>
    %cst_17 = arith.constant 1.000000e+00 : f32
    %36 = vector.broadcast %cst_17 : f32 to vector<4x256xf32>
    %37 = arith.addf %36, %35 : vector<4x256xf32>
    %cst_18 = arith.constant 1.000000e+00 : f32
    %38 = vector.broadcast %cst_18 : f32 to vector<4x256xf32>
    %39 = arith.divf %38, %37 : vector<4x256xf32>
    %cst_19 = arith.constant 1.06140542 : f32
    %40 = vector.broadcast %cst_19 : f32 to vector<4x256xf32>
    %41 = arith.mulf %40, %39 : vector<4x256xf32>
    %cst_20 = arith.constant -1.45315206 : f32
    %42 = vector.broadcast %cst_20 : f32 to vector<4x256xf32>
    %43 = arith.addf %41, %42 : vector<4x256xf32>
    %44 = arith.mulf %43, %39 : vector<4x256xf32>
    %cst_21 = arith.constant 1.42141378 : f32
    %45 = vector.broadcast %cst_21 : f32 to vector<4x256xf32>
    %46 = arith.addf %44, %45 : vector<4x256xf32>
    %47 = arith.mulf %46, %39 : vector<4x256xf32>
    %cst_22 = arith.constant -0.284496725 : f32
    %48 = vector.broadcast %cst_22 : f32 to vector<4x256xf32>
    %49 = arith.addf %47, %48 : vector<4x256xf32>
    %50 = arith.mulf %49, %39 : vector<4x256xf32>
    %cst_23 = arith.constant 0.254829586 : f32
    %51 = vector.broadcast %cst_23 : f32 to vector<4x256xf32>
    %52 = arith.addf %50, %51 : vector<4x256xf32>
    %53 = arith.mulf %52, %39 : vector<4x256xf32>
    %cst_24 = arith.constant 0.000000e+00 : f32
    %54 = vector.broadcast %cst_24 : f32 to vector<4x256xf32>
    %55 = arith.subf %54, %33 : vector<4x256xf32>
    %56 = arith.mulf %55, %33 : vector<4x256xf32>
    %57 = math.exp %56 : vector<4x256xf32>
    %58 = arith.mulf %53, %57 : vector<4x256xf32>
    %cst_25 = arith.constant 1.000000e+00 : f32
    %59 = vector.broadcast %cst_25 : f32 to vector<4x256xf32>
    %60 = arith.subf %59, %58 : vector<4x256xf32>
    %cst_26 = arith.constant 0.000000e+00 : f32
    %61 = vector.broadcast %cst_26 : f32 to vector<4x256xf32>
    %62 = arith.cmpf oge, %32, %61 : vector<4x256xf32>
    %cst_27 = arith.constant 0.000000e+00 : f32
    %63 = vector.broadcast %cst_27 : f32 to vector<4x256xf32>
    %64 = arith.subf %63, %60 : vector<4x256xf32>
    %65 = arith.select %62, %60, %64 : vector<4x256xi1>, vector<4x256xf32>
    %cst_28 = arith.constant 1.000000e+00 : f32
    %66 = vector.broadcast %cst_28 : f32 to vector<4x256xf32>
    %67 = arith.addf %66, %65 : vector<4x256xf32>
    %68 = arith.mulf %30, %67 : vector<4x256xf32>
    %c0_29 = arith.constant 0 : index
    %c0_30 = arith.constant 0 : index
    %69 = vector.load %arg7[%c0_29, %c0_30] : memref<1x256xf32, #tpu.memory_space<vmem>>, vector<1x256xf32>
    %70 = vector.broadcast %69 : vector<1x256xf32> to vector<4x256xf32>
    %71 = arith.mulf %68, %70 : vector<4x256xf32>
    %72 = vector.extract_strided_slice %71 {offsets = [0, 0], sizes = [4, 128], strides = [1, 1]} : vector<4x256xf32> to vector<4x128xf32>
    %73 = vector.extract_strided_slice %71 {offsets = [0, 128], sizes = [4, 128], strides = [1, 1]} : vector<4x256xf32> to vector<4x128xf32>
    %74 = arith.addf %72, %73 : vector<4x128xf32>
    %c0_31 = arith.constant 0 : index
    %c0_32 = arith.constant 0 : index
    %75 = vector.load %arg8[%c0_31, %c0_32] : memref<4x128xf32, #tpu.memory_space<vmem>>, vector<4x128xf32>
    %76 = arith.addf %75, %74 : vector<4x128xf32>
    %c0_33 = arith.constant 0 : index
    %c0_34 = arith.constant 0 : index
    %77 = vector.load %arg8[%c0_33, %c0_34] : memref<4x128xf32, #tpu.memory_space<vmem>>, vector<4x128xf32>
    tpu.vector_store %arg8[%c0_33, %c0_34], %76 {strides = array<i32>} : memref<4x128xf32, #tpu.memory_space<vmem>>, vector<4x128xf32>,
    return
  }
  func.func @transform_0(%arg0: i32, %arg1: i32) -> (i32, i32) {
    %c0_i32 = arith.constant 0 : i32
    %c0_i32_0 = arith.constant 0 : i32
    %c0_i32_1 = arith.constant 0 : i32
    return %c0_i32, %c0_i32_0 : i32, i32
  }
  func.func @transform_1(%arg0: i32, %arg1: i32) -> (i32, i32) {
    %c1_i32 = arith.constant 1 : i32
    %0 = arith.muli %arg0, %c1_i32 : i32
    %1 = arith.addi %0, %arg1 : i32
    %c0_i32 = arith.constant 0 : i32
    %c0_i32_0 = arith.constant 0 : i32
    return %c0_i32, %1 : i32, i32
  }
  func.func @transform_2(%arg0: i32, %arg1: i32) -> (i32, i32) {
    %c1_i32 = arith.constant 1 : i32
    %0 = arith.muli %arg0, %c1_i32 : i32
    %1 = arith.addi %0, %arg1 : i32
    %c0_i32 = arith.constant 0 : i32
    %c0_i32_0 = arith.constant 0 : i32
    return %c0_i32, %1 : i32, i32
  }
  func.func @transform_3(%arg0: i32, %arg1: i32) -> (i32, i32) {
    %c1_i32 = arith.constant 1 : i32
    %0 = arith.muli %arg0, %c1_i32 : i32
    %1 = arith.addi %0, %arg1 : i32
    %c0_i32 = arith.constant 0 : i32
    %c0_i32_0 = arith.constant 0 : i32
    return %c0_i32, %1 : i32, i32
  }
  func.func @transform_4(%arg0: i32, %arg1: i32) -> (i32, i32) {
    %c1_i32 = arith.constant 1 : i32
    %0 = arith.muli %arg0, %c1_i32 : i32
    %1 = arith.addi %0, %arg1 : i32
    %c0_i32 = arith.constant 0 : i32
    %c0_i32_0 = arith.constant 0 : i32
    return %c0_i32, %1 : i32, i32
  }
  func.func @transform_5(%arg0: i32, %arg1: i32) -> (i32, i32) {
    %c1_i32 = arith.constant 1 : i32
    %0 = arith.muli %arg0, %c1_i32 : i32
    %1 = arith.addi %0, %arg1 : i32
    %c0_i32 = arith.constant 0 : i32
    %c0_i32_0 = arith.constant 0 : i32
    return %c0_i32, %1 : i32, i32
  }
  func.func @transform_6(%arg0: i32, %arg1: i32) -> (i32, i32) {
    %c0_i32 = arith.constant 0 : i32
    %c0_i32_0 = arith.constant 0 : i32
    return %c0_i32, %arg0 : i32, i32
  }
}

</mosaic_0001>

<bundles_post_ra>
// kernel: tpu_custom_call.1
= control target key start
LH: loop header
LB: loop body
LE: loop exit
PB: predicated region body
PF: predicated region fallthrough
CT: control target
= control target key end

     0   :  { %11 = vsyncpa [#allocation3], 0  ;;  %s639_s0 = inlined_call_operand.hbm [shape: bf16[4,64], index: 0, kind: input, shape index: {}]   ;;  %s640_s1 = inlined_call_operand.hbm [shape: bf16[64,256], index: 1, kind: input, shape index: {}]   ;;  %s641_s2 = inlined_call_operand.vmem [shape: f32[1,256], index: 2, kind: input, shape index: {}]   ;;  %s642_s3 = inlined_call_operand.vmem [shape: f32[1,256], index: 3, kind: input, shape index: {}]   ;;  %s643_s4 = inlined_call_operand.vmem [shape: f32[1,256], index: 4, kind: input, shape index: {}]   ;;  %s644_s5 = inlined_call_operand.vmem [shape: f32[1,256], index: 5, kind: input, shape index: {}]   ;;  %s645_s6 = inlined_call_operand.hbm [shape: f32[4,128], index: 6, kind: output, shape index: {}]  }
   0x1   :  { %12 = vsyncpa [#allocation6], 0 }
   0x2   :  { %13 = vsyncpa [#allocation4], 0  ;;  %s526_s21 = smov [#allocation2]   ;;  %s527_s23 = smov [#allocation5]  }
   0x3   :  { %s20_s22 = sshll.u32 %s526_s21, 4  ;;  %s33_s24 = sshll.u32 %s527_s23, 4  ;;  %s21_s22 = int_to_ptr.vmem [resolvable:$true] %s20_s22  ;;  %s568_s24 = int_to_ptr.vmem [resolvable:$true] %s33_s24 }
   0x4   :  { %s454_s27 = scalar_lea.hbm %s639_s0, 32 }
   0x5   :  { %p455_p0 = scmp.ne.s32.totalorder %s639_s0, %s454_s27  ;;  %p458_p1 = scmp.lt.u32.totalorder %s454_s27, %s639_s0 }
   0x7   :  { %p460_p2 = pnand %p458_p1, %p455_p0 }
   0x9   :  { %463 = shalt.err (!%p460_p2)
}
   0xa   :  { %s464_s8 = scalar_lea.vmem %s21_s22, 32  ;;  %p469_p4 = scmp.lt.s32.totalorder %s21_s22, %s21_s22 }
   0xb   :  { %p465_p3 = scmp.ne.s32.totalorder %s21_s22, %s464_s8  ;;  %p470_p5 = scmp.lt.s32.totalorder %s464_s8, %s464_s8 }
   0xd   :  { %p471_p6 = por %p470_p5, %p469_p4 }
   0xf   :  { %p472_p7 = pnand %p471_p6, %p465_p3 }
  0x11   :  { %475 = shalt.err (!%p472_p7)
}
  0x12   :  { %23 = dma.hbm_to_vmem [thread:$0]  %s639_s0, 32, %s21_s22, [#allocation3]  }
  0x13   :  { %s476_s13 = scalar_lea.hbm %s640_s1, 1024 }
  0x14   :  { %p477_p8 = scmp.ne.s32.totalorder %s640_s1, %s476_s13  ;;  %p480_p9 = scmp.lt.u32.totalorder %s476_s13, %s640_s1 }
  0x16   :  { %p482_p10 = pnand %p480_p9, %p477_p8 }
  0x18   :  { %485 = shalt.err (!%p482_p10)
}
  0x19   :  { %s486_s18 = scalar_lea.vmem %s568_s24, 1024  ;;  %p491_p12 = scmp.lt.s32.totalorder %s568_s24, %s568_s24 }
  0x1a   :  { %p487_p11 = scmp.ne.s32.totalorder %s568_s24, %s486_s18  ;;  %p492_p13 = scmp.lt.s32.totalorder %s486_s18, %s486_s18 }
  0x1c   :  { %p493_p0 = por %p492_p13, %p491_p12 }
  0x1e   :  { %p494_p1 = pnand %p493_p0, %p487_p11 }
  0x20   :  { %497 = shalt.err (!%p494_p1)
}
  0x21   :  { %s528_s0 = smov 128   ;;  %s529_s19 = smov 8  }
  0x22   :  { %39 = dma.hbm_to_vmem [thread:$0]  %s640_s1, 1024, %s568_s24, [#allocation6], %s528_s0, %s528_s0, %s529_s19  }
  0x23   :  { %520 = dma.done.wait [#allocation3], 32  }
  0x24   :  { %521 = vsyncadd [#allocation3], 4294967264 }
  0x25   :  { %522 = dma.done.wait [#allocation6], 1024  }
  0x26   :  { %523 = vsyncadd [#allocation6], 4294966272  ;;  %v530_v0 = vmov 0   ;;  %v430_v1 = vld [vmem:[#allocation5 + $0x4] ss:$8 sps:$4 sm:$0xff]   ;;  %vm199_vm0 = vcmask 523264   ;;  %v149_v11 = vlaneseq }
  0x27   :  { %235 = vmatprep.mubr.bf16.mxu0 %v530_v0  ;;  %v432_v2 = vld [vmem:[#allocation5] ss:$8 sps:$4 sm:$0xff]   ;;  %203 = vmatprep.subr.bf16.mxu0 %v430_v1  ;;  %v433_v3 = vld [vmem:[#allocation5 + $0x14] ss:$8 sps:$4 sm:$0xff]   ;;  %v435_v4 = vld [vmem:[#allocation5 + $0x10] ss:$8 sps:$4 sm:$0xff]  }
  0x28   :  { %204 = vmatpush1.bf16.msra.mxu0 %v432_v2  ;;  %v436_v5 = vld [vmem:[#allocation5 + $0x24] ss:$8 sps:$4 sm:$0xff]   ;;  %v438_v6 = vld [vmem:[#allocation5 + $0x20] ss:$8 sps:$4 sm:$0xff]   ;;  %v439_v7 = vld [vmem:[#allocation5 + $0x34] ss:$8 sps:$4 sm:$0xff]  }
  0x29   :  { %205 = vmatprep.subr.bf16.mxu0 %v433_v3  ;;  %v441_v8 = vld [vmem:[#allocation5 + $0x30] ss:$8 sps:$4 sm:$0xff]   ;;  %v138_v9 = vld [vmem:[#allocation2] sm:$0x3]  ;;  %v531_v10 = vmov 0.0   ;;  %v150_v12 = vshrl.u32 %v149_v11, 7 }
  0x2a   :  { %137 = vst [vmem:[#allocation7] sm:$0xf] %v531_v10  ;;  %v147_v14 = vld [vmem:[%s641_s2] sm:$0x3]  ;;  %vm244_vm1 = vcmask 1043456   ;;  %s532_s26 = smov [#allocation7]  }
  0x2b   :  { %v599_v13 = vsub.s32 0, %v150_v12  ;;  %v604_v15 = vsub.s32 1, %v150_v12  ;;  %v288_v62 = vld [vmem:[%s642_s3] sm:$0x3]  ;;  %s392_s27 = sshll.u32 %s532_s26, 4  ;;  %s393_s27 = int_to_ptr.vmem [resolvable:$true] %s392_s27 }
  0x2c   :  { %206 = vmatpush1.bf16.msra.mxu0 %v435_v4  ;;  %v302_v63 = vld [vmem:[%s643_s4] sm:$0x3]  ;;  %p503_p3 = scmp.lt.s32.totalorder %s393_s27, %s393_s27 }
  0x2d   :  { %207 = vmatprep.subr.bf16.mxu0 %v436_v5  ;;  %v152_v16 = vrot.slane %v147_v14, %v599_v13  ;;  %v156_v17 = vrot.slane %v147_v14, %v604_v15  ;;  %v293_v0 = vrot.slane %v288_v62, %v599_v13  ;;  %v297_v2 = vrot.slane %v288_v62, %v604_v15 }
  0x2e   :  { %v307_v5 = vrot.slane %v302_v63, %v599_v13 }
  0x30   :  { %208 = vmatpush1.bf16.msra.mxu0 %v438_v6 }
  0x31   :  { %209 = vmatprep.subr.bf16.mxu0 %v439_v7  ;;  %v311_v7 = vrot.slane %v302_v63, %v604_v15 }
  0x34   :  { %210 = vmatpush1.bf16.msra.mxu0 %v441_v8 }
  0x37   :  { %422 = vmatmul.mubr.msk.bf16.vlgmr.msra.gmra.mrb[0].mxu0 %vm199_vm0, %v138_v9 }
 0x10a   :  { %v237_v18 = vpop.f32.mrb[0].mxu0 }
 0x10b   :  { %v238_v19 = vadd.f32 %v237_v18, %v152_v16  ;;  %v239_v20 = vpop.f32.mrb[1].mxu0 }
 0x10c   :  { %v240_v21 = vadd.f32 %v239_v20, %v156_v17  ;;  %v241_v22 = vpop.f32.mrb[2].mxu0 }
 0x10d   :  { %v245_v23 = vsel %vm244_vm1, %v238_v19, 0.0  ;;  %v242_v24 = vpop.f32.mrb[3].mxu0 }
 0x10e   :  { %v246_v25 = vrot.slane %v245_v23, 4  ;;  %v252_v26 = vsel %vm244_vm1, %v240_v21, 0.0 }
 0x10f   :  { %v253_v27 = vrot.slane %v252_v26, 4 }
 0x110   :  { %v247_v28 = vadd.f32 %v246_v25, %v245_v23 }
 0x111   :  { %v254_v29 = vadd.f32 %v253_v27, %v252_v26 }
 0x112   :  { %v248_v30 = vrot.slane %v247_v28, 2 }
 0x113   :  { %v255_v31 = vrot.slane %v254_v29, 2 }
 0x114   :  { %v249_v32 = vadd.f32 %v248_v30, %v247_v28 }
 0x115   :  { %v256_v33 = vadd.f32 %v255_v31, %v254_v29 }
 0x116   :  { %v250_v34 = vrot.slane %v249_v32, 1 }
 0x117   :  { %v257_v35 = vrot.slane %v256_v33, 1 }
 0x118   :  { %v251_v36 = vadd.f32 %v250_v34, %v249_v32 }
 0x119   :  { %v258_v37 = vadd.f32 %v257_v35, %v256_v33 }
 0x11a   :  { %v260_v38 = vmul.f32 0.25, %v251_v36 }
 0x11b   :  { %v261_v39 = vmul.f32 0.25, %v258_v37 }
 0x11c   :  { %v262_v40 = vsub.f32 %v238_v19, %v260_v38 }
 0x11d   :  { %v263_v41 = vsub.f32 %v240_v21, %v261_v39 }
 0x11e   :  { %v264_v42 = vmul.f32 %v262_v40, %v262_v40 }
 0x11f   :  { %v265_v43 = vmul.f32 %v263_v41, %v263_v41 }
 0x120   :  { %v266_v44 = vsel %vm244_vm1, %v264_v42, 0.0 }
 0x121   :  { %v267_v45 = vrot.slane %v266_v44, 4  ;;  %v273_v46 = vsel %vm244_vm1, %v265_v43, 0.0 }
 0x122   :  { %v274_v47 = vrot.slane %v273_v46, 4 }
 0x123   :  { %v268_v48 = vadd.f32 %v267_v45, %v266_v44 }
 0x124   :  { %v275_v49 = vadd.f32 %v274_v47, %v273_v46 }
 0x125   :  { %v269_v50 = vrot.slane %v268_v48, 2 }
 0x126   :  { %v276_v51 = vrot.slane %v275_v49, 2 }
 0x127   :  { %v270_v52 = vadd.f32 %v269_v50, %v268_v48 }
 0x128   :  { %v277_v53 = vadd.f32 %v276_v51, %v275_v49 }
 0x129   :  { %v271_v54 = vrot.slane %v270_v52, 1 }
 0x12a   :  { %v278_v55 = vrot.slane %v277_v53, 1 }
 0x12b   :  { %v272_v56 = vadd.f32 %v271_v54, %v270_v52 }
 0x12c   :  { %v279_v57 = vadd.f32 %v278_v55, %v277_v53  ;;  %v368_v55 = vld [vmem:[%s644_s5] sm:$0x3]  ;;  %s498_s5 = scalar_lea.vmem %s393_s27, 64 }
 0x12d   :  { %v280_v58 = vmul.f32 0.25, %v272_v56  ;;  %v377_v62 = vrot.slane %v368_v55, %v604_v15  ;;  %p499_p2 = scmp.ne.s32.totalorder %s393_s27, %s498_s5  ;;  %p504_p4 = scmp.lt.s32.totalorder %s498_s5, %s498_s5 }
 0x12e   :  { %v281_v59 = vmul.f32 0.25, %v279_v57 }
 0x12f   :  { %v282_v60 = vadd.f32 1e-05, %v280_v58  ;;  %p505_p5 = por %p504_p4, %p503_p3 }
 0x130   :  { %v283_v61 = vadd.f32 1e-05, %v281_v59 }
 0x131   :  { %442 = vrsqrt.f32 %v282_v60  ;;  %v373_v60 = vrot.slane %v368_v55, %v599_v13  ;;  %p506_p6 = pnand %p505_p5, %p499_p2 }
 0x132   :  { %444 = vrsqrt.f32 %v283_v61 }
 0x13b   :  { %v443_v1 = vpop.eup %442 }
 0x13c   :  { %v445_v3 = vpop.eup %444  ;;  %v286_v4 = vmul.f32 %v443_v1, %v262_v40 }
 0x13d   :  { %v287_v6 = vmul.f32 %v445_v3, %v263_v41  ;;  %v383_v3 = vld [vmem:[#allocation7] sm:$0xf] }
 0x13e   :  { %v300_v8 = vmul.f32 %v293_v0, %v286_v4 }
 0x13f   :  { %v301_v9 = vmul.f32 %v297_v2, %v287_v6 }
 0x140   :  { %v314_v10 = vadd.f32 %v307_v5, %v300_v8 }
 0x141   :  { %v315_v11 = vadd.f32 %v311_v7, %v301_v9 }
 0x142   :  { %v316_v12 = vmul.f32 0.70710677, %v314_v10 }
 0x143   :  { %v317_v14 = vmul.f32 0.70710677, %v315_v11 }
 0x144   :  { %v318_v16 = vand.u32 2147483647, %v316_v12  ;;  %vm358_vm2 = vcmp.ge.f32.partialorder %v316_v12, 0.0 }
 0x145   :  { %v319_v17 = vand.u32 2147483647, %v317_v14  ;;  %vm359_vm3 = vcmp.ge.f32.partialorder %v317_v14, 0.0 }
 0x146   :  { %v320_v18 = vmul.f32 0.3275911, %v318_v16  ;;  %v346_v22 = vsub.f32 0.0, %v318_v16 }
 0x147   :  { %v321_v19 = vmul.f32 0.3275911, %v319_v17  ;;  %v347_v23 = vsub.f32 0.0, %v319_v17 }
 0x148   :  { %v322_v20 = vadd.f32 1.0, %v320_v18  ;;  %v348_v25 = vmul.f32 %v346_v22, %v318_v16 }
 0x149   :  { %v323_v21 = vadd.f32 1.0, %v321_v19  ;;  %v349_v28 = vmul.f32 %v347_v23, %v319_v17 }
 0x14a   :  { %446 = vrcp.f32 %v322_v20  ;;  %v350_v31 = vmul.f32 1.442695, %v348_v25 }
 0x14b   :  { %448 = vrcp.f32 %v323_v21  ;;  %v352_v34 = vmul.f32 1.442695, %v349_v28 }
 0x14c   :  { %450 = vpow2.f32 %v350_v31 }
 0x14d   :  { %452 = vpow2.f32 %v352_v34 }
 0x154   :  { %v447_v24 = vpop.eup %446 }
 0x155   :  { %v449_v26 = vpop.eup %448  ;;  %v328_v27 = vmul.f32 1.0614054, %v447_v24 }
 0x156   :  { %v329_v29 = vmul.f32 1.0614054, %v449_v26  ;;  %v451_v47 = vpop.eup %450 }
 0x157   :  { %v330_v30 = vadd.f32 -1.4531521, %v328_v27  ;;  %v453_v49 = vpop.eup %452 }
 0x158   :  { %v331_v32 = vadd.f32 -1.4531521, %v329_v29 }
 0x159   :  { %v332_v33 = vmul.f32 %v447_v24, %v330_v30 }
 0x15a   :  { %v333_v35 = vmul.f32 %v449_v26, %v331_v32 }
 0x15b   :  { %v334_v36 = vadd.f32 1.4214138, %v332_v33 }
 0x15c   :  { %v335_v37 = vadd.f32 1.4214138, %v333_v35 }
 0x15d   :  { %v336_v38 = vmul.f32 %v447_v24, %v334_v36 }
 0x15e   :  { %v337_v39 = vmul.f32 %v449_v26, %v335_v37 }
 0x15f   :  { %v338_v40 = vadd.f32 -0.28449672, %v336_v38 }
 0x160   :  { %v339_v41 = vadd.f32 -0.28449672, %v337_v39 }
 0x161   :  { %v340_v42 = vmul.f32 %v447_v24, %v338_v40 }
 0x162   :  { %v341_v43 = vmul.f32 %v449_v26, %v339_v41 }
 0x163   :  { %v342_v44 = vadd.f32 0.2548296, %v340_v42 }
 0x164   :  { %v343_v45 = vadd.f32 0.2548296, %v341_v43 }
 0x165   :  { %v344_v46 = vmul.f32 %v447_v24, %v342_v44 }
 0x166   :  { %v345_v48 = vmul.f32 %v449_v26, %v343_v45 }
 0x167   :  { %v354_v50 = vmul.f32 %v451_v47, %v344_v46 }
 0x168   :  { %v355_v51 = vmul.f32 %v453_v49, %v345_v48 }
 0x169   :  { %v356_v52 = vsub.f32 1.0, %v354_v50 }
 0x16a   :  { %v357_v53 = vsub.f32 1.0, %v355_v51 }
 0x16b   :  { %v360_v54 = vsub.f32 0.0, %v356_v52 }
 0x16c   :  { %v361_v56 = vsub.f32 0.0, %v357_v53 }
 0x16d   :  { %v362_v57 = vsel %vm358_vm2, %v356_v52, %v360_v54 }
 0x16e   :  { %v364_v58 = vadd.f32 1.0, %v362_v57  ;;  %v363_v59 = vsel %vm359_vm3, %v357_v53, %v361_v56 }
 0x16f   :  { %v365_v61 = vadd.f32 1.0, %v363_v59 }
 0x170   :  { %v366_v63 = vmul.f32 %v364_v58, %v314_v10 }
 0x171   :  { %v367_v0 = vmul.f32 %v365_v61, %v315_v11 }
 0x172   :  { %v380_v1 = vmul.f32 %v373_v60, %v366_v63 }
 0x173   :  { %v381_v2 = vmul.f32 %v377_v62, %v367_v0 }
 0x175   :  { %v382_v4 = vadd.f32 %v381_v2, %v380_v1 }
 0x177   :  { %v384_v5 = vadd.f32 %v383_v3, %v382_v4 }
 0x179   :  { %385 = vst [vmem:[#allocation7] sm:$0xf] %v384_v5 }
 0x17a   :  { %509 = shalt.err (!%p506_p6)
}
 0x17b   :  { %s510_s30 = scalar_lea.hbm %s645_s6, 64 }
 0x17c   :  { %p511_p7 = scmp.ne.s32.totalorder %s645_s6, %s510_s30  ;;  %p514_p8 = scmp.lt.u32.totalorder %s510_s30, %s645_s6 }
 0x17e   :  { %p516_p9 = pnand %p514_p8, %p511_p7 }
 0x180   :  { %519 = shalt.err (!%p516_p9)
}
 0x181   :  { %395 = dma.vmem_to_hbm [thread:$0]  %s393_s27, 64, %s645_s6, [#allocation4]  }
 0x182   :  { %524 = dma.done.wait [#allocation4], 64  }
 0x183   :  { %525 = vsyncadd [#allocation4], 4294967232 }
 0x184   :  { %399 = vsyncpa [#allocation3], 1 }
 0x185   :  { %400 = vsyncpa [#allocation6], 1 }
 0x186   :  { %401 = vsyncpa [#allocation4], 1 }

</bundles_post_ra>
